<compile_context>
chip_gen: v7x
topology: tpu7x:2x2x1
jax: 0.10.0
libtpu: 0.0.40
codegen_flags: <defaults>
</compile_context>

<pallas_src>
import functools

import jax
import jax.numpy as jnp
import numpy as np
from jax.experimental import pallas as pl
from jax.experimental.pallas import tpu as pltpu


def _choose_block_rows(n, c, vmem_budget_bytes=16 << 20, max_rows=2048):
    """Row-tile size: multiple of 8, <= max_rows, fits the VMEM budget.

    Per row of a block the (double-buffered) VMEM footprint is:
      logits : 2 buffers * 4 B * padded_C   (f32, lanes padded to 128)
      targets: 2 buffers * 4 B * 128        ((rows, 1) int32 lane-pads to 128)
      acc    : 1 buffer  * 4 B * 128        ((rows, 1) f32 scratch)
    """
    padded_c = max(128, ((c + 127) // 128) * 128)
    bytes_per_row = 2 * 4 * padded_c + 2 * 4 * 128 + 4 * 128
    rows = vmem_budget_bytes // bytes_per_row
    rows = max(8, (rows // 8) * 8)
    rows = min(rows, max_rows)
    n_pad = ((n + 7) // 8) * 8                # never exceed the (padded) batch
    return min(rows, n_pad)


def _focal_loss_kernel(logits_ref, tgt_ref, out_ref, acc_ref,
                       *, alpha, gamma, total_n, inv_scale):
    i = pl.program_id(0)
    block_rows = logits_ref.shape[0]

    @pl.when(i == 0)
    def _():
        acc_ref[...] = jnp.zeros_like(acc_ref)

    x = logits_ref[...].astype(jnp.float32)               # (tm, C)
    tgt = tgt_ref[...]                                     # (tm, 1) int32

    # Row-wise softmax pieces; only the gathered class ever gets divided.
    m = jnp.max(x, axis=1, keepdims=True)                  # (tm, 1)
    e = jnp.exp(x - m)                                     # (tm, C)
    denom = jnp.sum(e, axis=1, keepdims=True)              # (tm, 1)

    # Gather e[target] per row via lane-iota compare + select (no float onehot).
    col = jax.lax.broadcasted_iota(jnp.int32, x.shape, 1)
    e_t = jnp.sum(jnp.where(col == tgt, e, 0.0), axis=1, keepdims=True)
    p_t = e_t / denom                                      # 1 divide per row

    # (1 - p_t) ** gamma without pow() for small integer gamma (gamma=2 -> mul).
    one_minus = 1.0 - p_t
    g = float(gamma)
    if g == 2.0:
        focal = one_minus * one_minus
    elif g.is_integer() and 0.0 <= g <= 8.0:
        focal = jnp.ones_like(one_minus)
        for _ in range(int(g)):
            focal = focal * one_minus
    else:
        focal = one_minus ** g

    loss = (-alpha) * focal * jnp.log(p_t + 1e-9)          # (tm, 1)

    # Mask rows past N (last partial tile of the cdiv grid).
    row = jax.lax.broadcasted_iota(jnp.int32, (block_rows, 1), 0)
    valid = (i * block_rows + row) < total_n
    loss = jnp.where(valid, loss, 0.0)

    # Elementwise vector accumulate (VPU only); reduce once at the very end.
    acc_ref[...] = acc_ref[...] + loss

    @pl.when(i == pl.num_programs(0) - 1)
    def _():
        # reduction='mean' (inv_scale = 1/N) or 'sum' (inv_scale = 1).
        out_ref[0, 0] = jnp.sum(acc_ref[...]) * jnp.float32(inv_scale)


def focal_loss(logits, targets, *, alpha=0.25, gamma=2.0, reduction="mean",
               block_rows=None):
    """Pallas TPU implementation of FocalLoss(alpha, gamma, reduction).

    logits:  (N, C) float
    targets: (N,)   int class indices
    returns: scalar float32 loss ('mean' or 'sum')
    """
    N, C = logits.shape
    if block_rows is None:
        block_rows = _choose_block_rows(N, C)
    if reduction == "mean":
        inv_scale = 1.0 / float(N)
    elif reduction == "sum":
        inv_scale = 1.0
    else:
        # TODO(synk): reduction='none' needs a per-row (N,) output; not wired up.
        raise NotImplementedError("only 'mean' and 'sum' reductions implemented")

    tgt2d = targets.astype(jnp.int32).reshape(N, 1)

    kernel = functools.partial(
        _focal_loss_kernel, alpha=float(alpha), gamma=float(gamma),
        total_n=N, inv_scale=inv_scale)

    out = pl.pallas_call(
        kernel,
        out_shape=jax.ShapeDtypeStruct((1, 1), jnp.float32),
        grid_spec=pltpu.PrefetchScalarGridSpec(
            num_scalar_prefetch=0,
            grid=(pl.cdiv(N, block_rows),),
            in_specs=[
                pl.BlockSpec((block_rows, C), lambda i: (i, 0)),
                pl.BlockSpec((block_rows, 1), lambda i: (i, 0)),
            ],
            out_specs=pl.BlockSpec(memory_space=pltpu.SMEM),
            scratch_shapes=[pltpu.VMEM((block_rows, 1), jnp.float32)],
        ),
        compiler_params=pltpu.CompilerParams(
            dimension_semantics=("arbitrary",),
            vmem_limit_bytes=32 * 1024 * 1024,
        ),
    )(logits, tgt2d)
    return out[0, 0]


def focal_loss_ref(logits, targets, alpha=0.25, gamma=2.0):
    prob = jax.nn.softmax(logits.astype(jnp.float32), axis=1)
    p_t = jnp.take_along_axis(prob, targets[:, None], axis=1)[:, 0]
    loss = -alpha * (1.0 - p_t) ** gamma * jnp.log(p_t + 1e-9)
    return loss.mean()


if __name__ == "__main__":
    key = jax.random.PRNGKey(0)
    k1, k2 = jax.random.split(key)

    N, C = 16, 32  # small synthetic classification batch: 16 samples, 32 classes
    logits = jax.random.normal(k1, (N, C), dtype=jnp.float32)
    targets = jax.random.randint(k2, (N,), 0, C, dtype=jnp.int32)

    out = focal_loss(logits, targets, alpha=0.25, gamma=2.0)
    out = jax.block_until_ready(out)

    ref = focal_loss_ref(logits, targets)
    assert np.allclose(np.asarray(out), np.asarray(ref), rtol=1e-5, atol=1e-6), (
        out, ref)

    print("KERNEL_OK")
</pallas_src>

<mosaic_0001>
module attributes {stable_mosaic.version = 11 : i64} {
  func.func @_focal_loss_kernel(%arg0: i32, %arg1: memref<16x32xf32, #tpu.memory_space<vmem>>, %arg2: memref<16x1xi32, #tpu.memory_space<vmem>>, %arg3: memref<1x1xf32, #tpu.memory_space<smem>>, %arg4: memref<16x1xf32, #tpu.memory_space<vmem>>) attributes {dimension_semantics = [#tpu.dimension_semantics<arbitrary>], iteration_bounds = array<i64: 1>, scalar_prefetch = 0 : i64, scratch_operands = 1 : i64, tpu.core_type = #tpu.core_type<tc>, window_params = [{transform_indices = @transform_0, window_bounds = array<i64: 16, 32>}, {transform_indices = @transform_1, window_bounds = array<i64: 16, 1>}, {transform_indices = @transform_2, window_bounds = array<i64: 1, 1>}]} {
    %c0_i32 = arith.constant 0 : i32
    %0 = arith.cmpi eq, %arg0, %c0_i32 : i32
    %1 = arith.extui %0 : i1 to i32
    %c0_i32_0 = arith.constant 0 : i32
    %2 = arith.cmpi ne, %1, %c0_i32_0 : i32
    scf.if %2 {
      %cst_18 = arith.constant 0.000000e+00 : f32
      %43 = vector.broadcast %cst_18 : f32 to vector<16x1xf32>
      %c0_19 = arith.constant 0 : index
      %c0_20 = arith.constant 0 : index
      %44 = vector.load %arg4[%c0_19, %c0_20] : memref<16x1xf32, #tpu.memory_space<vmem>>, vector<16x1xf32>
      tpu.vector_store %arg4[%c0_19, %c0_20], %43 {strides = array<i32>} : memref<16x1xf32, #tpu.memory_space<vmem>>, vector<16x1xf32>,
    } else {
    }
    %c0 = arith.constant 0 : index
    %c0_1 = arith.constant 0 : index
    %3 = vector.load %arg1[%c0, %c0_1] : memref<16x32xf32, #tpu.memory_space<vmem>>, vector<16x32xf32>
    %c0_2 = arith.constant 0 : index
    %c0_3 = arith.constant 0 : index
    %4 = vector.load %arg2[%c0_2, %c0_3] : memref<16x1xi32, #tpu.memory_space<vmem>>, vector<16x1xi32>
    %cst = arith.constant dense<0xFF800000> : vector<16xf32>
    %5 = vector.multi_reduction <maximumf>, %3, %cst [1] : vector<16x32xf32> to vector<16xf32>
    %6 = vector.shape_cast %5 : vector<16xf32> to vector<16x1xf32>
    %7 = vector.broadcast %6 : vector<16x1xf32> to vector<16x32xf32>
    %8 = arith.subf %3, %7 : vector<16x32xf32>
    %9 = math.exp %8 : vector<16x32xf32>
    %cst_4 = arith.constant dense<0.000000e+00> : vector<16xf32>
    %10 = vector.multi_reduction <add>, %9, %cst_4 [1] : vector<16x32xf32> to vector<16xf32>
    %11 = vector.shape_cast %10 : vector<16xf32> to vector<16x1xf32>
    %12 = tpu.iota {dimensions = array<i32: 1>} : vector<16x32xi32>
    %13 = vector.broadcast %4 : vector<16x1xi32> to vector<16x32xi32>
    %14 = arith.cmpi eq, %12, %13 : vector<16x32xi32>
    %cst_5 = arith.constant 0.000000e+00 : f32
    %15 = vector.broadcast %cst_5 : f32 to vector<16x32xf32>
    %16 = arith.select %14, %9, %15 : vector<16x32xi1>, vector<16x32xf32>
    %cst_6 = arith.constant dense<0.000000e+00> : vector<16xf32>
    %17 = vector.multi_reduction <add>, %16, %cst_6 [1] : vector<16x32xf32> to vector<16xf32>
    %18 = vector.shape_cast %17 : vector<16xf32> to vector<16x1xf32>
    %19 = arith.divf %18, %11 : vector<16x1xf32>
    %cst_7 = arith.constant 1.000000e+00 : f32
    %20 = vector.broadcast %cst_7 : f32 to vector<16x1xf32>
    %21 = arith.subf %20, %19 : vector<16x1xf32>
    %22 = arith.mulf %21, %21 : vector<16x1xf32>
    %cst_8 = arith.constant -2.500000e-01 : f32
    %23 = vector.broadcast %cst_8 : f32 to vector<16x1xf32>
    %24 = arith.mulf %23, %22 : vector<16x1xf32>
    %cst_9 = arith.constant 9.99999971E-10 : f32
    %25 = vector.broadcast %cst_9 : f32 to vector<16x1xf32>
    %26 = arith.addf %19, %25 : vector<16x1xf32>
    %27 = math.log %26 : vector<16x1xf32>
    %28 = arith.mulf %24, %27 : vector<16x1xf32>
    %29 = tpu.iota {dimensions = array<i32: 0>} : vector<16x1xi32>
    %c16_i32 = arith.constant 16 : i32
    %30 = arith.muli %arg0, %c16_i32 : i32
    %31 = vector.broadcast %30 : i32 to vector<16x1xi32>
    %32 = arith.addi %31, %29 : vector<16x1xi32>
    %c16_i32_10 = arith.constant 16 : i32
    %33 = vector.broadcast %c16_i32_10 : i32 to vector<16x1xi32>
    %34 = arith.cmpi slt, %32, %33 : vector<16x1xi32>
    %cst_11 = arith.constant 0.000000e+00 : f32
    %35 = vector.broadcast %cst_11 : f32 to vector<16x1xf32>
    %36 = arith.select %34, %28, %35 : vector<16x1xi1>, vector<16x1xf32>
    %c0_12 = arith.constant 0 : index
    %c0_13 = arith.constant 0 : index
    %37 = vector.load %arg4[%c0_12, %c0_13] : memref<16x1xf32, #tpu.memory_space<vmem>>, vector<16x1xf32>
    %38 = arith.addf %37, %36 : vector<16x1xf32>
    %c0_14 = arith.constant 0 : index
    %c0_15 = arith.constant 0 : index
    %39 = vector.load %arg4[%c0_14, %c0_15] : memref<16x1xf32, #tpu.memory_space<vmem>>, vector<16x1xf32>
    tpu.vector_store %arg4[%c0_14, %c0_15], %38 {strides = array<i32>} : memref<16x1xf32, #tpu.memory_space<vmem>>, vector<16x1xf32>,
    %c0_i32_16 = arith.constant 0 : i32
    %40 = arith.cmpi eq, %arg0, %c0_i32_16 : i32
    %41 = arith.extui %40 : i1 to i32
    %c0_i32_17 = arith.constant 0 : i32
    %42 = arith.cmpi ne, %41, %c0_i32_17 : i32
    scf.if %42 {
      %c0_18 = arith.constant 0 : index
      %c0_19 = arith.constant 0 : index
      %43 = vector.load %arg4[%c0_18, %c0_19] : memref<16x1xf32, #tpu.memory_space<vmem>>, vector<16x1xf32>
      %44 = vector.shape_cast %43 : vector<16x1xf32> to vector<1x16x1xf32>
      %cst_20 = arith.constant dense<0.000000e+00> : vector<1xf32>
      %45 = vector.multi_reduction <add>, %44, %cst_20 [1, 2] : vector<1x16x1xf32> to vector<1xf32>
      %46 = vector.shape_cast %45 : vector<1xf32> to vector<1x1x1xf32>
      %47 = vector.extract %46[0, 0, 0] : f32 from vector<1x1x1xf32>
      %cst_21 = arith.constant 6.250000e-02 : f32
      %48 = arith.mulf %47, %cst_21 : f32
      %c0_22 = arith.constant 0 : index
      %c0_23 = arith.constant 0 : index
      %49 = memref.load %arg3[%c0_22, %c0_23] : memref<1x1xf32, #tpu.memory_space<smem>>
      memref.store %48, %arg3[%c0_22, %c0_23] : memref<1x1xf32, #tpu.memory_space<smem>>
    } else {
    }
    return
  }
  func.func @transform_0(%arg0: i32) -> (i32, i32) {
    %c0_i32 = arith.constant 0 : i32
    %c0_i32_0 = arith.constant 0 : i32
    return %arg0, %c0_i32 : i32, i32
  }
  func.func @transform_1(%arg0: i32) -> (i32, i32) {
    %c0_i32 = arith.constant 0 : i32
    %c0_i32_0 = arith.constant 0 : i32
    return %arg0, %c0_i32 : i32, i32
  }
  func.func @transform_2(%arg0: i32) -> (i32, i32) {
    %c0_i32 = arith.constant 0 : i32
    %c0_i32_0 = arith.constant 0 : i32
    %c0_i32_1 = arith.constant 0 : i32
    return %c0_i32, %c0_i32_0 : i32, i32
  }
}

</mosaic_0001>

<bundles_post_ra>
// kernel: tpu_custom_call.1
= control target key start
LH: loop header
LB: loop body
LE: loop exit
PB: predicated region body
PF: predicated region fallthrough
CT: control target
= control target key end

     0   :  { %vm23_vm0 = vcmask 261120   ;;  %v160_v4 = vmov 0   ;;  %s214_s0 = inlined_call_operand.vmem [shape: f32[16,32], index: 0, kind: input, shape index: {}]   ;;  %s215_s1 = inlined_call_operand.vmem [shape: s32[16,1], index: 1, kind: input, shape index: {}]   ;;  %s216_s2 = inlined_call_operand.hbm [shape: f32[1,1], index: 2, kind: output, shape index: {}]  }
   0x1   :  { %v19_v0 = vld [vmem:[%s214_s0] sm:$0xff]  ;;  %v20_v1 = vld [vmem:[%s214_s0 + $0x8] sm:$0xff]  ;;  %134 = vset.pattern.permute.xlu1 %v160_v4  ;;  %135 = vset.pattern.permute.xlu0 %v160_v4 }
   0x2   :  { %v21_v2 = vld [vmem:[%s215_s1] sm:$0xff]  ;;  %v24_v3 = vsel %vm23_vm0, %v19_v0, -inf }
   0x3   :  { %7 = vsyncpa [#allocation4], 0  ;;  %25 = vmax.xlane.f32.xlu0 %v24_v3  ;;  %45 = vperm.xlu1 %134, %v21_v2   ;;  %v27_v5 = vsel %vm23_vm0, %v20_v1, -inf  ;;  %v22_v6 = vld [vmem:[%s215_s1 + $0x8] sm:$0xff]  ;;  %v42_v12 = vlaneseq  ;;  %vm16_vm3 = vcmask 7168   ;;  %v161_v25 = vmov 0.0  }
   0x4   :  { %17 = vst.msk [vmem:[#allocation2] sm:$0xff] %vm16_vm3, %v161_v25  ;;  %18 = vst.msk [vmem:[#allocation2 + $0x8] sm:$0xff] %vm16_vm3, %v161_v25  ;;  %s148_s19 = scalar_lea.hbm %s216_s2, 16 }
   0x5   :  { %v43_v15 = vand.u32 127, %v42_v12  ;;  %p149_p0 = scmp.ne.s32.totalorder %s216_s2, %s148_s19  ;;  %p152_p1 = scmp.lt.u32.totalorder %s148_s19, %s216_s2 }
   0x7   :  { %28 = vmax.xlane.f32.xlu0 %v27_v5  ;;  %48 = vperm.xlu1 %134, %v22_v6   ;;  %p154_p2 = pnand %p152_p1, %p149_p0 }
   0xb   :  { %v89_v43 = vld [vmem:[#allocation2] sm:$0xff]  ;;  %v90_v49 = vld [vmem:[#allocation2 + $0x8] sm:$0xff] }
  0x82   :  { %v46_v14 = vpop.permute.xlu1 %45 }
  0x83   :  { %vm50_vm1 = vcmp.eq.s32.totalorder %v43_v15, %v46_v14 }
  0x86   :  { %v49_v17 = vpop.permute.xlu1 %48 }
  0x87   :  { %vm51_vm2 = vcmp.eq.s32.totalorder %v43_v15, %v49_v17 }
  0x90   :  { %v26_v7 = vpop.xlane.xlu0 %25 }
  0x91   :  { %v30_v8 = vsub.f32 %v19_v0, %v26_v7 }
  0x93   :  { %v32_v9 = vmul.f32 1.442695, %v30_v8 }
  0x94   :  { %v29_v10 = vpop.xlane.xlu0 %28 }
  0x95   :  { %136 = vpow2.f32 %v32_v9  ;;  %v31_v11 = vsub.f32 %v20_v1, %v29_v10 }
  0x97   :  { %v34_v13 = vmul.f32 1.442695, %v31_v11 }
  0x99   :  { %138 = vpow2.f32 %v34_v13 }
  0x9f   :  { %v137_v16 = vpop.eup %136 }
  0xa0   :  { %v36_v18 = vsel %vm23_vm0, %v137_v16, 0.0  ;;  %v52_v19 = vsel %vm50_vm1, %v137_v16, 0.0 }
  0xa1   :  { %37 = vadd.xlane.f32.xlu0 %v36_v18  ;;  %v54_v21 = vsel %vm23_vm0, %v52_v19, 0.0 }
  0xa3   :  { %v139_v20 = vpop.eup %138 }
  0xa4   :  { %v39_v22 = vsel %vm23_vm0, %v139_v20, 0.0  ;;  %v53_v23 = vsel %vm51_vm2, %v139_v20, 0.0 }
  0xa5   :  { %55 = vadd.xlane.f32.xlu0 %v54_v21  ;;  %40 = vadd.xlane.f32.xlu1 %v39_v22  ;;  %v57_v24 = vsel %vm23_vm0, %v53_v23, 0.0 }
  0xa9   :  { %58 = vadd.xlane.f32.xlu0 %v57_v24 }
 0x12e   :  { %v38_v26 = vpop.xlane.xlu0 %37 }
 0x12f   :  { %140 = vrcp.f32 %v38_v26 }
 0x132   :  { %v41_v27 = vpop.xlane.xlu1 %40  ;;  %v56_v28 = vpop.xlane.xlu0 %55 }
 0x133   :  { %142 = vrcp.f32 %v41_v27 }
 0x136   :  { %v59_v33 = vpop.xlane.xlu0 %58 }
 0x139   :  { %v141_v29 = vpop.eup %140 }
 0x13a   :  { %v61_v30 = vmul.f32 %v141_v29, %v56_v28 }
 0x13c   :  { %v70_v31 = vadd.f32 1e-09, %v61_v30  ;;  %v64_v36 = vsub.f32 1.0, %v61_v30 }
 0x13d   :  { %v143_v32 = vpop.eup %142 }
 0x13e   :  { %144 = vlog2.f32 %v70_v31  ;;  %v63_v34 = vmul.f32 %v143_v32, %v59_v33  ;;  %v66_v37 = vmul.f32 %v64_v36, %v64_v36 }
 0x140   :  { %v71_v35 = vadd.f32 1e-09, %v63_v34  ;;  %v65_v38 = vsub.f32 1.0, %v63_v34  ;;  %v68_v40 = vmul.f32 -0.25, %v66_v37 }
 0x142   :  { %146 = vlog2.f32 %v71_v35  ;;  %v67_v42 = vmul.f32 %v65_v38, %v65_v38 }
 0x144   :  { %v69_v47 = vmul.f32 -0.25, %v67_v42 }
 0x148   :  { %v145_v39 = vpop.eup %144 }
 0x149   :  { %v73_v41 = vmul.f32 0.6931472, %v145_v39 }
 0x14b   :  { %v76_v44 = vmul.f32 %v73_v41, %v68_v40 }
 0x14c   :  { %v147_v45 = vpop.eup %146 }
 0x14d   :  { %v91_v46 = vadd.f32 %v89_v43, %v76_v44  ;;  %v75_v48 = vmul.f32 0.6931472, %v147_v45 }
 0x14f   :  { %94 = vst.msk [vmem:[#allocation2] sm:$0xff] %vm16_vm3, %v91_v46  ;;  %v77_v50 = vmul.f32 %v75_v48, %v69_v47 }
 0x151   :  { %v92_v51 = vadd.f32 %v90_v49, %v77_v50 }
 0x153   :  { %95 = vst.msk [vmem:[#allocation2 + $0x8] sm:$0xff] %vm16_vm3, %v92_v51 }
 0x156   :  { %v99_v52 = vld [vmem:[#allocation2] sm:$0xff] }
 0x157   :  { %v101_v54 = vsel %vm16_vm3, %v99_v52, 0.0 }
 0x15a   :  { %v100_v53 = vld [vmem:[#allocation2 + $0x8] sm:$0xff] }
 0x15b   :  { %v102_v55 = vsel %vm16_vm3, %v100_v53, 0.0 }
 0x15c   :  { %v103_v56 = vadd.f32 %v102_v55, %v101_v54 }
 0x15e   :  { %104 = vadd.xlane.f32.xlu0 %v103_v56 }
 0x1eb   :  { %v105_v57 = vpop.xlane.xlu0 %104 }
 0x1ec   :  { %v106_v58 = vrot.slane %v105_v57, 4 }
 0x1ee   :  { %v107_v59 = vadd.f32 %v106_v58, %v105_v57 }
 0x1f0   :  { %v108_v60 = vrot.slane %v107_v59, 2 }
 0x1f2   :  { %v109_v61 = vadd.f32 %v108_v60, %v107_v59 }
 0x1f4   :  { %v110_v62 = vrot.slane %v109_v61, 1 }
 0x1f6   :  { %v111_v63 = vadd.f32 %v110_v62, %v109_v61 }
 0x1f8   :  { %129 = vpush %v111_v63 }
 0x229   :  { %s130_s0 = spop %129 }
 0x22a   :  { %s113_s1 = smul.f32 0.0625, %s130_s0 }
 0x22c   :  { %115 = sst [smem:[#allocation3]] %s113_s1 }
 0x22d   :  { %157 = shalt.err (!%p154_p2)
}
 0x22e   :  { %s162_s24 = smov [#allocation3]  }
 0x22f   :  { %123 = dma.smem_to_hbm %s162_s24, 16, %s216_s2, [#allocation4]  }
 0x230   :  { %158 = dma.done.wait [#allocation4], 16  }
 0x231   :  { %159 = vsyncadd [#allocation4], 4294967280 }
 0x232   :  { %127 = sfence }
 0x233   :  { %128 = vsyncpa [#allocation4], 1 }

</bundles_post_ra>
